<compile_context>
chip_gen: v7x
topology: tpu7x:2x2x1
jax: 0.10.0
libtpu: 0.0.40
codegen_flags: <defaults>
</compile_context>

<pallas_src>
import jax
import jax.numpy as jnp
from jax.experimental import pallas as pl
from jax.experimental.pallas import tpu as pltpu

N_HID = 60
N_PAD = 64          # hidden dim padded to a sublane multiple (8)
LANE = 128          # TPU lane width
TB_MAX = 512        # batch-tile size along the lane axis


def _mlp_kernel(x_ref, w1_ref, b1_ref, w2_ref, b2_ref, o_ref):
    # Feature-major layout (batch on the 128-lane axis):
    #   x_ref  : [2, TB]      (features x batch)
    #   w1_ref : [N_PAD, 2]   (hidden  x features)
    #   b1_ref : [N_PAD, 1]
    #   w2_ref : [N_PAD, 1]
    #   b2_ref : [1]          (SMEM scalar)
    #   o_ref  : [1, TB]      lane-dense output
    x0 = x_ref[0:1, :]                                   # [1, TB]
    x1 = x_ref[1:2, :]                                   # [1, TB]
    # Layer 1 on the VPU (K=2 is far too small for the MXU): broadcast FMA.
    h = w1_ref[:, 0:1] * x0 + w1_ref[:, 1:2] * x1 + b1_ref[...]   # [N_PAD, TB]
    h = jnp.maximum(h, 0.0)
    # Layer 2 (N=1) as elementwise mul + cross-sublane reduce (XLU).
    y = jnp.sum(h * w2_ref[...], axis=0, keepdims=True)           # [1, TB]
    o_ref[...] = (y + b2_ref[0]).astype(o_ref.dtype)


def _round_up(x, m):
    return ((x + m - 1) // m) * m


def net_forward(x, w1, b1, w2, b2):
    """Forward pass of Net.

    x: [B, 2] f32; w1: [2, N_HID]; b1: [1, N_HID]; w2: [N_HID, 1]; b2: [1, 1]
    (weights stored transposed w.r.t. torch, i.e. y = x @ W + b). Returns [B, 1].
    """
    B = x.shape[0]

    # Wrapper-side layout plumbing: feature-major, hidden padded to 64,
    # batch padded to a multiple of the lane-aligned batch tile.
    tb = min(TB_MAX, _round_up(B, LANE))
    b_pad = _round_up(B, tb)

    x_t = jnp.zeros((2, b_pad), jnp.float32).at[:, :B].set(x.T)
    w1_fm = jnp.zeros((N_PAD, 2), jnp.float32).at[:N_HID, :].set(w1.T)
    b1_fm = jnp.zeros((N_PAD, 1), jnp.float32).at[:N_HID, :].set(b1.T)
    w2_fm = jnp.zeros((N_PAD, 1), jnp.float32).at[:N_HID, :].set(w2)
    b2_s = b2.reshape((1,)).astype(jnp.float32)

    out_fm = pl.pallas_call(
        _mlp_kernel,
        out_shape=jax.ShapeDtypeStruct((1, b_pad), jnp.float32),
        grid_spec=pltpu.PrefetchScalarGridSpec(
            num_scalar_prefetch=0,
            grid=(b_pad // tb,),
            in_specs=[
                pl.BlockSpec((2, tb), lambda i: (0, i)),        # x tile (batch)
                pl.BlockSpec((N_PAD, 2), lambda i: (0, 0)),     # w1 (resident)
                pl.BlockSpec((N_PAD, 1), lambda i: (0, 0)),     # b1 (resident)
                pl.BlockSpec((N_PAD, 1), lambda i: (0, 0)),     # w2 (resident)
                pl.BlockSpec(memory_space=pltpu.MemorySpace.SMEM),  # b2 scalar
            ],
            out_specs=pl.BlockSpec((1, tb), lambda i: (0, i)),
        ),
        compiler_params=pltpu.CompilerParams(
            dimension_semantics=("parallel",),
        ),
    )(x_t, w1_fm, b1_fm, w2_fm, b2_s)

    return out_fm[:, :B].T


def init_params(key):
    """Deterministic init mimicking torch.nn.Linear (uniform(-1/sqrt(fan_in), +))."""
    k1, k2, k3, k4 = jax.random.split(key, 4)
    bound1 = 1.0 / jnp.sqrt(2.0)            # fan_in of dense = 2
    bound2 = 1.0 / jnp.sqrt(float(N_HID))   # fan_in of output = N_HID
    w1 = jax.random.uniform(k1, (2, N_HID), jnp.float32, -bound1, bound1)
    b1 = jax.random.uniform(k2, (1, N_HID), jnp.float32, -bound1, bound1)
    w2 = jax.random.uniform(k3, (N_HID, 1), jnp.float32, -bound2, bound2)
    b2 = jax.random.uniform(k4, (1, 1), jnp.float32, -bound2, bound2)
    return w1, b1, w2, b2


def reference_forward(x, w1, b1, w2, b2):
    h = jnp.maximum(x @ w1 + b1, 0.0)
    return h @ w2 + b2


if __name__ == "__main__":
    key = jax.random.PRNGKey(0)
    k_x, k_p = jax.random.split(key)

    w1, b1, w2, b2 = init_params(k_p)

    # Small demo batch matching the original "add two numbers" task.
    # (For batches this tiny, plain XLA would beat any custom kernel; the
    #  Pallas path is written to pay off once B is in the thousands.)
    B = 8
    x = jax.random.uniform(k_x, (B, 2), jnp.float32, 0.0, 10.0)
    out = jax.block_until_ready(net_forward(x, w1, b1, w2, b2))
    ref = reference_forward(x, w1, b1, w2, b2)
    assert out.shape == (B, 1)
    assert jnp.allclose(out, ref, atol=1e-5, rtol=1e-5)

    # Larger, non-multiple batch exercising the multi-tile grid + padding path.
    B2 = 1000
    x2 = jax.random.uniform(k_x, (B2, 2), jnp.float32, 0.0, 10.0)
    out2 = jax.block_until_ready(net_forward(x2, w1, b1, w2, b2))
    ref2 = reference_forward(x2, w1, b1, w2, b2)
    assert out2.shape == (B2, 1)
    assert jnp.allclose(out2, ref2, atol=1e-4, rtol=1e-5)

    print("KERNEL_OK")
</pallas_src>

<mosaic_0001>
module attributes {stable_mosaic.version = 11 : i64} {
  func.func @_mlp_kernel(%arg0: i32, %arg1: memref<2x128xf32, #tpu.memory_space<vmem>>, %arg2: memref<64x2xf32, #tpu.memory_space<vmem>>, %arg3: memref<64x1xf32, #tpu.memory_space<vmem>>, %arg4: memref<64x1xf32, #tpu.memory_space<vmem>>, %arg5: memref<1xf32, #tpu.memory_space<smem>>, %arg6: memref<1x128xf32, #tpu.memory_space<vmem>>) attributes {dimension_semantics = [#tpu.dimension_semantics<parallel>], iteration_bounds = array<i64: 1>, scalar_prefetch = 0 : i64, scratch_operands = 0 : i64, tpu.core_type = #tpu.core_type<tc>, window_params = [{transform_indices = @transform_0, window_bounds = array<i64: 2, 128>}, {pipeline_mode = #tpu.pipeline_mode<synchronous>, transform_indices = @transform_1, window_bounds = array<i64: 64, 2>}, {pipeline_mode = #tpu.pipeline_mode<synchronous>, transform_indices = @transform_2, window_bounds = array<i64: 64, 1>}, {pipeline_mode = #tpu.pipeline_mode<synchronous>, transform_indices = @transform_3, window_bounds = array<i64: 64, 1>}, {transform_indices = @transform_4, window_bounds = array<i64: 1>}, {transform_indices = @transform_5, window_bounds = array<i64: 1, 128>}]} {
    %c0 = arith.constant 0 : index
    %c0_0 = arith.constant 0 : index
    %0 = vector.load %arg1[%c0, %c0_0] : memref<2x128xf32, #tpu.memory_space<vmem>>, vector<1x128xf32>
    %c1 = arith.constant 1 : index
    %c0_1 = arith.constant 0 : index
    %1 = vector.load %arg1[%c1, %c0_1] : memref<2x128xf32, #tpu.memory_space<vmem>>, vector<1x128xf32>
    %c0_2 = arith.constant 0 : index
    %c0_3 = arith.constant 0 : index
    %2 = vector.load %arg2[%c0_2, %c0_3] : memref<64x2xf32, #tpu.memory_space<vmem>>, vector<64x1xf32>
    %3 = vector.broadcast %2 : vector<64x1xf32> to vector<64x128xf32>
    %4 = vector.broadcast %0 : vector<1x128xf32> to vector<64x128xf32>
    %5 = arith.mulf %3, %4 : vector<64x128xf32>
    %c0_4 = arith.constant 0 : index
    %c1_5 = arith.constant 1 : index
    %6 = vector.load %arg2[%c0_4, %c1_5] : memref<64x2xf32, #tpu.memory_space<vmem>>, vector<64x1xf32>
    %7 = vector.broadcast %6 : vector<64x1xf32> to vector<64x128xf32>
    %8 = vector.broadcast %1 : vector<1x128xf32> to vector<64x128xf32>
    %9 = arith.mulf %7, %8 : vector<64x128xf32>
    %10 = arith.addf %5, %9 : vector<64x128xf32>
    %c0_6 = arith.constant 0 : index
    %c0_7 = arith.constant 0 : index
    %11 = vector.load %arg3[%c0_6, %c0_7] : memref<64x1xf32, #tpu.memory_space<vmem>>, vector<64x1xf32>
    %12 = vector.broadcast %11 : vector<64x1xf32> to vector<64x128xf32>
    %13 = arith.addf %10, %12 : vector<64x128xf32>
    %cst = arith.constant 0.000000e+00 : f32
    %14 = vector.broadcast %cst : f32 to vector<64x128xf32>
    %15 = arith.maximumf %13, %14 : vector<64x128xf32>
    %c0_8 = arith.constant 0 : index
    %c0_9 = arith.constant 0 : index
    %16 = vector.load %arg4[%c0_8, %c0_9] : memref<64x1xf32, #tpu.memory_space<vmem>>, vector<64x1xf32>
    %17 = vector.broadcast %16 : vector<64x1xf32> to vector<64x128xf32>
    %18 = arith.mulf %15, %17 : vector<64x128xf32>
    %cst_10 = arith.constant dense<0.000000e+00> : vector<128xf32>
    %19 = vector.multi_reduction <add>, %18, %cst_10 [0] : vector<64x128xf32> to vector<128xf32>
    %20 = vector.shape_cast %19 : vector<128xf32> to vector<1x128xf32>
    %c0_11 = arith.constant 0 : index
    %21 = memref.load %arg5[%c0_11] : memref<1xf32, #tpu.memory_space<smem>>
    %22 = vector.broadcast %21 : f32 to vector<1x128xf32>
    %23 = arith.addf %20, %22 : vector<1x128xf32>
    %c0_12 = arith.constant 0 : index
    %c0_13 = arith.constant 0 : index
    %24 = vector.load %arg6[%c0_12, %c0_13] : memref<1x128xf32, #tpu.memory_space<vmem>>, vector<1x128xf32>
    tpu.vector_store %arg6[%c0_12, %c0_13], %23 {strides = array<i32>} : memref<1x128xf32, #tpu.memory_space<vmem>>, vector<1x128xf32>,
    return
  }
  func.func @transform_0(%arg0: i32) -> (i32, i32) {
    %c0_i32 = arith.constant 0 : i32
    %c0_i32_0 = arith.constant 0 : i32
    return %c0_i32, %arg0 : i32, i32
  }
  func.func @transform_1(%arg0: i32) -> (i32, i32) {
    %c0_i32 = arith.constant 0 : i32
    %c0_i32_0 = arith.constant 0 : i32
    %c0_i32_1 = arith.constant 0 : i32
    return %c0_i32, %c0_i32_0 : i32, i32
  }
  func.func @transform_2(%arg0: i32) -> (i32, i32) {
    %c0_i32 = arith.constant 0 : i32
    %c0_i32_0 = arith.constant 0 : i32
    %c0_i32_1 = arith.constant 0 : i32
    return %c0_i32, %c0_i32_0 : i32, i32
  }
  func.func @transform_3(%arg0: i32) -> (i32, i32) {
    %c0_i32 = arith.constant 0 : i32
    %c0_i32_0 = arith.constant 0 : i32
    %c0_i32_1 = arith.constant 0 : i32
    return %c0_i32, %c0_i32_0 : i32, i32
  }
  func.func @transform_4(%arg0: i32) -> i32 {
    %c0_i32 = arith.constant 0 : i32
    %c0_i32_0 = arith.constant 0 : i32
    return %c0_i32 : i32
  }
  func.func @transform_5(%arg0: i32) -> (i32, i32) {
    %c0_i32 = arith.constant 0 : i32
    %c0_i32_0 = arith.constant 0 : i32
    return %c0_i32, %arg0 : i32, i32
  }
}

</mosaic_0001>

<bundles_post_ra>
// kernel: tpu_custom_call.1
= control target key start
LH: loop header
LB: loop body
LE: loop exit
PB: predicated region body
PF: predicated region fallthrough
CT: control target
= control target key end

     0   :  { %v327_v2 = vmov 1   ;;  %v328_v3 = vmov 0   ;;  %s453_s0 = inlined_call_operand.vmem [shape: f32[2,128], index: 0, kind: input, shape index: {}]   ;;  %s454_s1 = inlined_call_operand.vmem [shape: f32[64,2], index: 1, kind: input, shape index: {}]   ;;  %s455_s2 = inlined_call_operand.vmem [shape: f32[64,1], index: 2, kind: input, shape index: {}]   ;;  %s456_s3 = inlined_call_operand.vmem [shape: f32[64,1], index: 3, kind: input, shape index: {}]   ;;  %s457_s4 = inlined_call_operand.<no memory space> [shape: f32[1], index: 4, kind: input, shape index: {}]   ;;  %s458_s5 = inlined_call_operand.hbm [shape: f32[1,128], index: 5, kind: output, shape index: {}]  }
   0x1   :  { %v26_v0 = vld [vmem:[%s454_s1 + $0x10] sm:$0xff]  ;;  %v24_v1 = vld [vmem:[%s454_s1] sm:$0xff]  ;;  %293 = vset.pattern.permute.xlu0 %v327_v2  ;;  %292 = vset.pattern.permute.xlu1 %v328_v3  ;;  %v27_v4 = vld [vmem:[%s454_s1 + $0x18] sm:$0xff] }
   0x2   :  { %44 = vperm.xlu1 %292, %v26_v0   ;;  %85 = vperm.xlu0 %293, %v24_v1   ;;  %v29_v5 = vld [vmem:[%s454_s1 + $0x28] sm:$0xff] }
   0x6   :  { %49 = vperm.xlu1 %292, %v27_v4   ;;  %97 = vperm.xlu0 %293, %v27_v4  }
   0x7   :  { %11 = vsyncpa [#allocation4], 0  ;;  %v25_v6 = vld [vmem:[%s454_s1 + $0x8] sm:$0xff]  ;;  %v28_v7 = vld [vmem:[%s454_s1 + $0x20] sm:$0xff]  ;;  %s329_s18 = smov [#allocation3]  }
   0x8   :  { %v136_v8 = vld [vmem:[%s455_s2] sm:$0xff]  ;;  %v137_v9 = vld [vmem:[%s455_s2 + $0x8] sm:$0xff]  ;;  %v138_v11 = vld [vmem:[%s455_s2 + $0x10] sm:$0xff]  ;;  %s279_s19 = sshll.u32 %s329_s18, 4  ;;  %s280_s19 = int_to_ptr.vmem [resolvable:$true] %s279_s19 }
   0x9   :  { %v201_v10 = vld [vmem:[%s456_s3 + $0x8] sm:$0xff]  ;;  %v140_v12 = vld [vmem:[%s455_s2 + $0x20] sm:$0xff]  ;;  %v139_v13 = vld [vmem:[%s455_s2 + $0x18] sm:$0xff]  ;;  %s303_s20 = scalar_lea.vmem %s280_s19, 16  ;;  %s307_s21 = scalar_lea.vmem %s280_s19, 32 }
   0xa   :  { %59 = vperm.xlu1 %292, %v29_v5   ;;  %105 = vperm.xlu0 %293, %v29_v5   ;;  %v31_v14 = vld [vmem:[%s454_s1 + $0x38] sm:$0xff]  ;;  %v200_v15 = vld [vmem:[%s456_s3] sm:$0xff]  ;;  %v141_v16 = vld [vmem:[%s455_s2 + $0x28] sm:$0xff]  ;;  %p304_p0 = scmp.ne.s32.totalorder %s280_s19, %s303_s20  ;;  %p308_p1 = scmp.lt.s32.totalorder %s280_s19, %s280_s19 }
   0xb   :  { %v30_v17 = vld [vmem:[%s454_s1 + $0x30] sm:$0xff]  ;;  %v143_v19 = vld [vmem:[%s455_s2 + $0x38] sm:$0xff]  ;;  %v204_v23 = vld [vmem:[%s456_s3 + $0x20] sm:$0xff]  ;;  %p309_p2 = scmp.lt.s32.totalorder %s307_s21, %s303_s20 }
   0xc   :  { %v142_v18 = vld [vmem:[%s455_s2 + $0x30] sm:$0xff]  ;;  %v203_v22 = vld [vmem:[%s456_s3 + $0x18] sm:$0xff]  ;;  %v205_v24 = vld [vmem:[%s456_s3 + $0x28] sm:$0xff] }
   0xd   :  { %v206_v20 = vld [vmem:[%s456_s3 + $0x30] sm:$0xff]  ;;  %v207_v25 = vld [vmem:[%s456_s3 + $0x38] sm:$0xff]  ;;  %v287_v46 = vld [vmem:[%s453_s0] ss:$0 sm:$0xff]  ;;  %p310_p3 = por %p309_p2, %p308_p1 }
   0xe   :  { %294 = vset.pattern.permute.xlu1 %v327_v2  ;;  %298 = vset.pattern.permute.xlu0 %v328_v3  ;;  %v202_v21 = vld [vmem:[%s456_s3 + $0x10] sm:$0xff]  ;;  %v288_v47 = vld [vmem:[%s453_s0 + $0x1] ss:$0 sm:$0xff] }
   0xf   :  { %89 = vperm.xlu1 %294, %v25_v6   ;;  %34 = vperm.xlu0 %298, %v24_v1   ;;  %p311_p4 = pnand %p310_p3, %p304_p0 }
  0x13   :  { %93 = vperm.xlu1 %294, %v26_v0   ;;  %39 = vperm.xlu0 %298, %v25_v6  }
  0x17   :  { %295 = vset.pattern.permute.xlu1 %v328_v3  ;;  %54 = vperm.xlu0 %298, %v28_v7  }
  0x18   :  { %146 = vperm.xlu1 %295, %v136_v8  }
  0x1b   :  { %151 = vperm.xlu0 %298, %v137_v9  }
  0x1c   :  { %296 = vset.pattern.permute.xlu1 %v327_v2 }
  0x1d   :  { %101 = vperm.xlu1 %296, %v28_v7  }
  0x1f   :  { %215 = vperm.xlu0 %298, %v201_v10  }
  0x21   :  { %297 = vset.pattern.permute.xlu1 %v328_v3 }
  0x22   :  { %156 = vperm.xlu1 %297, %v138_v11  }
  0x23   :  { %166 = vperm.xlu0 %298, %v140_v12  }
  0x26   :  { %161 = vperm.xlu1 %297, %v139_v13  }
  0x27   :  { %69 = vperm.xlu0 %298, %v31_v14  }
  0x2a   :  { %210 = vperm.xlu1 %297, %v200_v15  }
  0x2b   :  { %171 = vperm.xlu0 %298, %v141_v16  }
  0x2e   :  { %64 = vperm.xlu1 %297, %v30_v17  }
  0x2f   :  { %176 = vperm.xlu0 %298, %v142_v18  }
  0x32   :  { %299 = vset.pattern.permute.xlu1 %v327_v2 }
  0x33   :  { %109 = vperm.xlu1 %299, %v30_v17   ;;  %181 = vperm.xlu0 %298, %v143_v19  }
  0x37   :  { %300 = vset.pattern.permute.xlu1 %v328_v3  ;;  %240 = vperm.xlu0 %298, %v206_v20  }
  0x38   :  { %220 = vperm.xlu1 %300, %v202_v21  }
  0x3c   :  { %301 = vset.pattern.permute.xlu1 %v327_v2 }
  0x3d   :  { %113 = vperm.xlu1 %301, %v31_v14  }
  0x41   :  { %302 = vset.pattern.permute.xlu1 %v328_v3 }
  0x42   :  { %225 = vperm.xlu1 %302, %v203_v22  }
  0x46   :  { %230 = vperm.xlu1 %302, %v204_v23  }
  0x4a   :  { %235 = vperm.xlu1 %302, %v205_v24  }
  0x4e   :  { %245 = vperm.xlu1 %302, %v207_v25  }
  0x81   :  { %v45_v26 = vpop.permute.xlu1 %44  ;;  %v86_v27 = vpop.permute.xlu0 %85 }
  0x82   :  { %v120_v48 = vmul.f32 %v288_v47, %v86_v27  ;;  %v78_v57 = vmul.f32 %v287_v46, %v45_v26 }
  0x85   :  { %v50_v28 = vpop.permute.xlu1 %49  ;;  %v98_v29 = vpop.permute.xlu0 %97 }
  0x86   :  { %v79_v58 = vmul.f32 %v287_v46, %v50_v28  ;;  %v123_v59 = vmul.f32 %v288_v47, %v98_v29 }
  0x88   :  { %v131_v4 = vadd.f32 %v123_v59, %v79_v58 }
  0x89   :  { %v60_v30 = vpop.permute.xlu1 %59  ;;  %v106_v31 = vpop.permute.xlu0 %105 }
  0x8a   :  { %v81_v7 = vmul.f32 %v287_v46, %v60_v30  ;;  %v125_v8 = vmul.f32 %v288_v47, %v106_v31 }
  0x8c   :  { %v133_v20 = vadd.f32 %v125_v8, %v81_v7 }
  0x8e   :  { %v90_v32 = vpop.permute.xlu1 %89  ;;  %v35_v33 = vpop.permute.xlu0 %34 }
  0x8f   :  { %v76_v49 = vmul.f32 %v287_v46, %v35_v33  ;;  %v121_v53 = vmul.f32 %v288_v47, %v90_v32 }
  0x91   :  { %v128_v55 = vadd.f32 %v120_v48, %v76_v49 }
  0x92   :  { %v94_v34 = vpop.permute.xlu1 %93  ;;  %v40_v35 = vpop.permute.xlu0 %39 }
  0x93   :  { %v77_v52 = vmul.f32 %v287_v46, %v40_v35  ;;  %v122_v54 = vmul.f32 %v288_v47, %v94_v34 }
  0x95   :  { %v129_v60 = vadd.f32 %v121_v53, %v77_v52  ;;  %v130_v2 = vadd.f32 %v122_v54, %v78_v57 }
  0x96   :  { %v55_v37 = vpop.permute.xlu0 %54 }
  0x97   :  { %v147_v36 = vpop.permute.xlu1 %146  ;;  %v80_v61 = vmul.f32 %v287_v46, %v55_v37 }
  0x98   :  { %v184_v0 = vadd.f32 %v147_v36, %v128_v55 }
  0x9a   :  { %v152_v39 = vpop.permute.xlu0 %151  ;;  %v192_v10 = vmax.f32 %v184_v0, 0.0 }
  0x9b   :  { %v185_v1 = vadd.f32 %v152_v39, %v129_v60 }
  0x9c   :  { %v102_v38 = vpop.permute.xlu1 %101 }
  0x9d   :  { %v124_v62 = vmul.f32 %v288_v47, %v102_v38  ;;  %v193_v11 = vmax.f32 %v185_v1, 0.0 }
  0x9e   :  { %v216_v42 = vpop.permute.xlu0 %215 }
  0x9f   :  { %v132_v9 = vadd.f32 %v124_v62, %v80_v61  ;;  %v249_v22 = vmul.f32 %v216_v42, %v193_v11 }
  0xa1   :  { %v157_v40 = vpop.permute.xlu1 %156 }
  0xa2   :  { %v167_v44 = vpop.permute.xlu0 %166  ;;  %v186_v3 = vadd.f32 %v157_v40, %v130_v2 }
  0xa3   :  { %v188_v14 = vadd.f32 %v167_v44, %v132_v9 }
  0xa4   :  { %v194_v16 = vmax.f32 %v186_v3, 0.0 }
  0xa5   :  { %v162_v41 = vpop.permute.xlu1 %161  ;;  %v196_v26 = vmax.f32 %v188_v14, 0.0 }
  0xa6   :  { %v70_v51 = vpop.permute.xlu0 %69  ;;  %v187_v12 = vadd.f32 %v162_v41, %v131_v4 }
  0xa7   :  { %v83_v24 = vmul.f32 %v287_v46, %v70_v51 }
  0xa8   :  { %v195_v23 = vmax.f32 %v187_v12, 0.0 }
  0xa9   :  { %v211_v43 = vpop.permute.xlu1 %210 }
  0xaa   :  { %v172_v63 = vpop.permute.xlu0 %171  ;;  %v248_v17 = vmul.f32 %v211_v43, %v192_v10 }
  0xab   :  { %v189_v27 = vadd.f32 %v172_v63, %v133_v20 }
  0xac   :  { %v256_v28 = vadd.f32 %v249_v22, %v248_v17 }
  0xad   :  { %v65_v45 = vpop.permute.xlu1 %64  ;;  %v197_v36 = vmax.f32 %v189_v27, 0.0 }
  0xae   :  { %v82_v13 = vmul.f32 %v287_v46, %v65_v45  ;;  %v177_v15 = vpop.permute.xlu0 %176 }
  0xb2   :  { %v110_v50 = vpop.permute.xlu1 %109  ;;  %v182_v32 = vpop.permute.xlu0 %181 }
  0xb3   :  { %v126_v5 = vmul.f32 %v288_v47, %v110_v50 }
  0xb5   :  { %v134_v18 = vadd.f32 %v126_v5, %v82_v13 }
  0xb6   :  { %v241_v43 = vpop.permute.xlu0 %240 }
  0xb7   :  { %v221_v56 = vpop.permute.xlu1 %220  ;;  %v190_v29 = vadd.f32 %v177_v15, %v134_v18 }
  0xb8   :  { %v250_v25 = vmul.f32 %v221_v56, %v194_v16  ;;  %v270_v56 = vstv %s457_s4 }
  0xb9   :  { %v198_v37 = vmax.f32 %v190_v29, 0.0 }
  0xba   :  { %v257_v34 = vadd.f32 %v256_v28, %v250_v25 }
  0xbb   :  { %v254_v44 = vmul.f32 %v241_v43, %v198_v37 }
  0xbc   :  { %v114_v6 = vpop.permute.xlu1 %113 }
  0xbd   :  { %v127_v19 = vmul.f32 %v288_v47, %v114_v6 }
  0xbf   :  { %v135_v30 = vadd.f32 %v127_v19, %v83_v24 }
  0xc1   :  { %v226_v21 = vpop.permute.xlu1 %225  ;;  %v191_v39 = vadd.f32 %v182_v32, %v135_v30 }
  0xc2   :  { %v251_v31 = vmul.f32 %v226_v21, %v195_v23 }
  0xc3   :  { %v199_v46 = vmax.f32 %v191_v39, 0.0 }
  0xc4   :  { %v258_v38 = vadd.f32 %v257_v34, %v251_v31 }
  0xc5   :  { %v231_v33 = vpop.permute.xlu1 %230 }
  0xc6   :  { %v252_v35 = vmul.f32 %v231_v33, %v196_v26 }
  0xc8   :  { %v259_v41 = vadd.f32 %v258_v38, %v252_v35 }
  0xc9   :  { %v236_v40 = vpop.permute.xlu1 %235 }
  0xca   :  { %v253_v42 = vmul.f32 %v236_v40, %v197_v36 }
  0xcc   :  { %v260_v45 = vadd.f32 %v259_v41, %v253_v42 }
  0xcd   :  { %v246_v47 = vpop.permute.xlu1 %245 }
  0xce   :  { %v255_v48 = vmul.f32 %v246_v47, %v199_v46  ;;  %v261_v49 = vadd.f32 %v260_v45, %v254_v44 }
  0xd0   :  { %v262_v50 = vadd.f32 %v261_v49, %v255_v48 }
  0xd2   :  { %v263_v51 = vrot.slane %v262_v50, 4 }
  0xd4   :  { %v264_v52 = vadd.f32 %v263_v51, %v262_v50 }
  0xd6   :  { %v265_v53 = vrot.slane %v264_v52, 2 }
  0xd8   :  { %v266_v54 = vadd.f32 %v265_v53, %v264_v52 }
  0xda   :  { %v267_v55 = vrot.slane %v266_v54, 1 }
  0xdc   :  { %v268_v57 = vadd.f32 %v267_v55, %v266_v54 }
  0xde   :  { %v271_v58 = vadd.f32 %v270_v56, %v268_v57 }
  0xe0   :  { %272 = vst [vmem:[#allocation3] sm:$0x1] %v271_v58 }
  0xe1   :  { %314 = shalt.err (!%p311_p4)
}
  0xe2   :  { %s315_s24 = scalar_lea.hbm %s458_s5, 16 }
  0xe3   :  { %p316_p5 = scmp.ne.s32.totalorder %s458_s5, %s315_s24  ;;  %p319_p6 = scmp.lt.u32.totalorder %s315_s24, %s458_s5 }
  0xe5   :  { %p321_p7 = pnand %p319_p6, %p316_p5 }
  0xe7   :  { %324 = shalt.err (!%p321_p7)
}
  0xe8   :  { %282 = dma.vmem_to_hbm [thread:$0]  %s280_s19, 16, %s458_s5, [#allocation4]  }
  0xe9   :  { %325 = dma.done.wait [#allocation4], 16  }
  0xea   :  { %326 = vsyncadd [#allocation4], 4294967280 }
  0xeb   :  { %286 = vsyncpa [#allocation4], 1 }

</bundles_post_ra>
